<compile_context>
chip_gen: v6e
topology: v6e:2x2x1
jax: 0.10.0
libtpu: 0.0.40
codegen_flags: <defaults>
</compile_context>

<pallas_src>
import jax
import jax.numpy as jnp
from jax.experimental import pallas as pl
from jax.experimental.pallas import tpu as pltpu


# ---------------------------------------------------------------------------
# Kernel
# ---------------------------------------------------------------------------
def make_block_kernel(H, W, Cin, Cout, has_projection):
    """Build the fused Block kernel for a given (H, W, Cin, Cout) and shortcut kind."""
    WCi = W * Cin
    WCo = W * Cout

    def kernel(*args):
        if has_projection:
            (x_ref, t1_ref, b1_ref, t2_ref, b2_ref, tsc_ref, bsc_ref,
             out_ref, xpad_ref, hpad_ref) = args
        else:
            (x_ref, t1_ref, b1_ref, t2_ref, b2_ref,
             out_ref, xpad_ref, hpad_ref) = args

        # Packed input image: (H, W*Cin), bf16 (lane axis = W*Cin).
        x = x_ref[0]

        zero_in = jnp.zeros((1, WCi), jnp.float32)
        zero_h = jnp.zeros((1, WCo), jnp.float32)

        # ---- conv1: sum over the 3 kernel rows of (H, W*Cin) @ (W*Cin, W*Cout) ----
        # Row halo lives in a small f32 scratch; only the two halo rows are
        # zeroed (interior is fully overwritten every grid step).  The W-border
        # zero padding is already folded into the Toeplitz weights.
        xpad_ref[0:1, :] = zero_in
        xpad_ref[H + 1:H + 2, :] = zero_in
        xpad_ref[1:H + 1, :] = x.astype(jnp.float32)

        x_up = xpad_ref[0:H, :].astype(jnp.bfloat16)        # row h-1 (kh = 0 tap)
        x_dn = xpad_ref[2:H + 2, :].astype(jnp.bfloat16)    # row h+1 (kh = 2 tap)

        acc1 = jnp.dot(x_up, t1_ref[0], preferred_element_type=jnp.float32)
        acc1 += jnp.dot(x, t1_ref[1], preferred_element_type=jnp.float32)  # center tap: reuse x
        acc1 += jnp.dot(x_dn, t1_ref[2], preferred_element_type=jnp.float32)
        # BN1 scale is folded into t1; only bias + ReLU here (f32 epilogue).
        h = jnp.maximum(acc1 + b1_ref[...], 0.0)             # (H, W*Cout) f32

        # ---- conv2 (same scheme on the intermediate) ----
        hpad_ref[0:1, :] = zero_h
        hpad_ref[H + 1:H + 2, :] = zero_h
        hpad_ref[1:H + 1, :] = h

        h_up = hpad_ref[0:H, :].astype(jnp.bfloat16)
        h_dn = hpad_ref[2:H + 2, :].astype(jnp.bfloat16)

        acc2 = jnp.dot(h_up, t2_ref[0], preferred_element_type=jnp.float32)
        acc2 += jnp.dot(h.astype(jnp.bfloat16), t2_ref[1],
                        preferred_element_type=jnp.float32)  # center tap: reuse h
        acc2 += jnp.dot(h_dn, t2_ref[2], preferred_element_type=jnp.float32)
        out = acc2 + b2_ref[...]                             # BN2 folded, no ReLU yet

        # ---- shortcut ----
        if has_projection:
            # 1x1 conv + BN as one block-diagonal matmul in the packed layout,
            # reusing the already-loaded x (no re-slicing of the input).
            sc = jnp.dot(x, tsc_ref[...], preferred_element_type=jnp.float32) + bsc_ref[...]
        else:
            # Identity shortcut: no matmul, no weight DMA.
            sc = x.astype(jnp.float32)

        # ---- residual add + final ReLU; lane-dense (H, W*Cout) store ----
        out_ref[0] = jnp.maximum(out + sc, 0.0)

    return kernel


# ---------------------------------------------------------------------------
# Wrapper
# ---------------------------------------------------------------------------
def block_forward(x_nchw, packed):
    """x_nchw: (N, Cin, H, W) float32. Returns (N, Cout, H, W) float32."""
    N, Cin, H, W = x_nchw.shape
    WCo = packed["b1p"].shape[-1]
    Cout = WCo // W
    WCi = W * Cin
    has_projection = "tsc" in packed

    # NCHW -> NHWC -> pack (W, C) onto the lane axis: (N, H, W*Cin); bf16 for MXU/DMA.
    x = jnp.transpose(x_nchw, (0, 2, 3, 1)).reshape(N, H, WCi).astype(jnp.bfloat16)

    kernel = make_block_kernel(H, W, Cin, Cout, has_projection)

    in_specs = [
        pl.BlockSpec((1, H, WCi), lambda n: (n, 0, 0)),       # packed input image
        pl.BlockSpec((3, WCi, WCo), lambda n: (0, 0, 0)),     # conv1 Toeplitz weights
        pl.BlockSpec((1, WCo), lambda n: (0, 0)),             # conv1 folded-BN bias
        pl.BlockSpec((3, WCo, WCo), lambda n: (0, 0, 0)),     # conv2 Toeplitz weights
        pl.BlockSpec((1, WCo), lambda n: (0, 0)),             # conv2 folded-BN bias
    ]
    args = [x, packed["t1"], packed["b1p"], packed["t2"], packed["b2p"]]
    if has_projection:
        in_specs += [pl.BlockSpec((WCi, WCo), lambda n: (0, 0)),  # shortcut weights
                     pl.BlockSpec((1, WCo), lambda n: (0, 0))]    # shortcut bias
        args += [packed["tsc"], packed["bscp"]]

    out_packed = pl.pallas_call(
        kernel,
        out_shape=jax.ShapeDtypeStruct((N, H, WCo), jnp.float32),
        grid_spec=pltpu.PrefetchScalarGridSpec(
            num_scalar_prefetch=0,
            grid=(N,),
            in_specs=in_specs,
            out_specs=pl.BlockSpec((1, H, WCo), lambda n: (n, 0, 0)),
            scratch_shapes=[pltpu.VMEM((H + 2, WCi), jnp.float32),   # x with H halo
                            pltpu.VMEM((H + 2, WCo), jnp.float32)],  # h with H halo
        ),
        compiler_params=pltpu.CompilerParams(
            dimension_semantics=("parallel",),
            vmem_limit_bytes=32 * 1024 * 1024,
        ),
    )(*args)

    out = out_packed.reshape(N, H, W, Cout)
    return jnp.transpose(out, (0, 3, 1, 2))                   # back to NCHW


# ---------------------------------------------------------------------------
# Parameter building (one-time constant folding in the wrapper)
# ---------------------------------------------------------------------------
def fold_bn(gamma, beta, mean, var, eps=1e-5):
    scale = gamma / jnp.sqrt(var + eps)
    bias = beta - mean * scale
    return scale, bias


def make_params(key, input_channels, planes):
    """Synthetic parameters matching the PyTorch module; BN scale folded into weights."""
    ks = jax.random.split(key, 6)
    w1_oihw = jax.random.normal(ks[0], (planes, input_channels, 3, 3), jnp.float32) * 0.1
    w2_oihw = jax.random.normal(ks[1], (planes, planes, 3, 3), jnp.float32) * 0.1
    w1 = jnp.transpose(w1_oihw, (2, 3, 1, 0))                 # HWIO
    w2 = jnp.transpose(w2_oihw, (2, 3, 1, 0))

    def bn_params(k):
        kg, kb, km, kv = jax.random.split(k, 4)
        gamma = 1.0 + 0.1 * jax.random.normal(kg, (planes,), jnp.float32)
        beta = 0.1 * jax.random.normal(kb, (planes,), jnp.float32)
        mean = 0.1 * jax.random.normal(km, (planes,), jnp.float32)
        var = jnp.abs(jax.random.normal(kv, (planes,), jnp.float32)) + 0.5
        return gamma, beta, mean, var

    s1, b1 = fold_bn(*bn_params(ks[2]))
    s2, b2 = fold_bn(*bn_params(ks[3]))

    has_projection = input_channels != planes                 # stride fixed to 1
    params = dict(
        w1f=(w1 * s1).astype(jnp.bfloat16),                   # BN1 scale folded, bf16 for MXU
        b1=b1.astype(jnp.float32),
        w2f=(w2 * s2).astype(jnp.bfloat16),
        b2=b2.astype(jnp.float32),
        has_projection=has_projection,
    )
    if has_projection:
        wsc_oihw = jax.random.normal(ks[4], (planes, input_channels, 1, 1), jnp.float32) * 0.1
        wsc = jnp.transpose(wsc_oihw, (2, 3, 1, 0))[0, 0]     # (Cin, Cout)
        ssc, bsc = fold_bn(*bn_params(ks[5]))
        params["wscf"] = (wsc * ssc).astype(jnp.bfloat16)
        params["bsc"] = bsc.astype(jnp.float32)
    return params


def _toeplitz_w(w_hwio, W):
    """(3,3,Ci,Co) conv weights -> (3, W*Ci, W*Co) per-kernel-row matrices.

    T[kh][wi*Ci + c, wo*Co + o] = w[kh, kw, c, o] with wi = wo + kw - 1;
    out-of-range taps are dropped, which implements the W-boundary zero padding.
    """
    KH, KW, Ci, Co = w_hwio.shape
    w = w_hwio.astype(jnp.float32)
    mats = []
    for kh in range(KH):
        T = jnp.zeros((W * Ci, W * Co), jnp.float32)
        for kw in range(KW):
            shift = jnp.eye(W, W, k=1 - kw, dtype=jnp.float32)  # [wi, wo] = 1 iff wi == wo + kw - 1
            T = T + jnp.kron(shift, w[kh, kw])
        mats.append(T)
    return jnp.stack(mats)


def pack_for_kernel(params, W):
    """Fold weights into packed (W*C)-lane layout: Toeplitz matrices + tiled biases."""
    Cout = params["b1"].shape[0]
    packed = dict(
        t1=_toeplitz_w(params["w1f"], W).astype(jnp.bfloat16),
        b1p=jnp.tile(params["b1"], W).reshape(1, W * Cout),
        t2=_toeplitz_w(params["w2f"], W).astype(jnp.bfloat16),
        b2p=jnp.tile(params["b2"], W).reshape(1, W * Cout),
    )
    if params["has_projection"]:
        packed["tsc"] = jnp.kron(jnp.eye(W, dtype=jnp.float32),
                                 params["wscf"].astype(jnp.float32)).astype(jnp.bfloat16)
        packed["bscp"] = jnp.tile(params["bsc"], W).reshape(1, W * Cout)
    return packed


# ---------------------------------------------------------------------------
# Pure-JAX reference (mirrors the kernel's bf16 quantization of operands)
# ---------------------------------------------------------------------------
def reference_forward(x_nchw, params):
    x = jnp.transpose(x_nchw, (0, 2, 3, 1)).astype(jnp.bfloat16)

    def conv3x3(inp_bf16, w_bf16):
        return jax.lax.conv_general_dilated(
            inp_bf16.astype(jnp.float32), w_bf16.astype(jnp.float32),
            window_strides=(1, 1), padding=((1, 1), (1, 1)),
            dimension_numbers=("NHWC", "HWIO", "NHWC"))

    h = jnp.maximum(conv3x3(x, params["w1f"]) + params["b1"], 0.0)
    out = conv3x3(h.astype(jnp.bfloat16), params["w2f"]) + params["b2"]
    if params["has_projection"]:
        sc = jnp.einsum("nhwc,co->nhwo",
                        x.astype(jnp.float32),
                        params["wscf"].astype(jnp.float32)) + params["bsc"]
    else:
        sc = x.astype(jnp.float32)
    out = jnp.maximum(out + sc, 0.0)
    return jnp.transpose(out, (0, 3, 1, 2))


# ---------------------------------------------------------------------------
if __name__ == "__main__":
    key = jax.random.PRNGKey(0)
    kx1, kp1, kx2, kp2 = jax.random.split(key, 4)

    N, Cin, H, W = 2, 4, 16, 16
    planes = 8

    # ---- projection-shortcut case (Cin != planes) ----
    x = jax.random.normal(kx1, (N, Cin, H, W), jnp.float32)
    params = make_params(kp1, Cin, planes)
    packed = pack_for_kernel(params, W)
    out = jax.block_until_ready(block_forward(x, packed))
    ref = reference_forward(x, params)
    assert out.shape == (N, planes, H, W)
    # Tolerance covers bf16-operand rounding-order effects (reference uses the
    # same bf16-quantized operands; real bugs produce O(0.1-1) errors).
    assert jnp.allclose(out, ref, rtol=1e-2, atol=1e-2), "projection path mismatch"

    # ---- identity-shortcut case (Cin == planes): no shortcut matmul compiled ----
    x2 = jax.random.normal(kx2, (N, planes, H, W), jnp.float32)
    params2 = make_params(kp2, planes, planes)
    packed2 = pack_for_kernel(params2, W)
    out2 = jax.block_until_ready(block_forward(x2, packed2))
    ref2 = reference_forward(x2, params2)
    assert out2.shape == (N, planes, H, W)
    assert jnp.allclose(out2, ref2, rtol=1e-2, atol=1e-2), "identity path mismatch"

    print("KERNEL_OK")
</pallas_src>

<mosaic_0001>
module attributes {stable_mosaic.version = 11 : i64} {
  func.func @kernel(%arg0: i32, %arg1: memref<1x16x64xbf16, #tpu.memory_space<vmem>>, %arg2: memref<3x64x128xbf16, #tpu.memory_space<vmem>>, %arg3: memref<1x128xf32, #tpu.memory_space<vmem>>, %arg4: memref<3x128x128xbf16, #tpu.memory_space<vmem>>, %arg5: memref<1x128xf32, #tpu.memory_space<vmem>>, %arg6: memref<64x128xbf16, #tpu.memory_space<vmem>>, %arg7: memref<1x128xf32, #tpu.memory_space<vmem>>, %arg8: memref<1x16x128xf32, #tpu.memory_space<vmem>>, %arg9: memref<18x64xf32, #tpu.memory_space<vmem>>, %arg10: memref<18x128xf32, #tpu.memory_space<vmem>>) attributes {dimension_semantics = [#tpu.dimension_semantics<parallel>], iteration_bounds = array<i64: 2>, scalar_prefetch = 0 : i64, scratch_operands = 2 : i64, tpu.core_type = #tpu.core_type<tc>, window_params = [{transform_indices = @transform_0, window_bounds = array<i64: 1, 16, 64>}, {pipeline_mode = #tpu.pipeline_mode<synchronous>, transform_indices = @transform_1, window_bounds = array<i64: 3, 64, 128>}, {pipeline_mode = #tpu.pipeline_mode<synchronous>, transform_indices = @transform_2, window_bounds = array<i64: 1, 128>}, {pipeline_mode = #tpu.pipeline_mode<synchronous>, transform_indices = @transform_3, window_bounds = array<i64: 3, 128, 128>}, {pipeline_mode = #tpu.pipeline_mode<synchronous>, transform_indices = @transform_4, window_bounds = array<i64: 1, 128>}, {pipeline_mode = #tpu.pipeline_mode<synchronous>, transform_indices = @transform_5, window_bounds = array<i64: 64, 128>}, {pipeline_mode = #tpu.pipeline_mode<synchronous>, transform_indices = @transform_6, window_bounds = array<i64: 1, 128>}, {transform_indices = @transform_7, window_bounds = array<i64: 1, 16, 128>}]} {
    %c0 = arith.constant 0 : index
    %c0_0 = arith.constant 0 : index
    %c0_1 = arith.constant 0 : index
    %0 = vector.load %arg1[%c0, %c0_0, %c0_1] : memref<1x16x64xbf16, #tpu.memory_space<vmem>>, vector<1x16x64xbf16>
    %1 = vector.shape_cast %0 : vector<1x16x64xbf16> to vector<16x64xbf16>
    %cst = arith.constant 0.000000e+00 : f32
    %2 = vector.broadcast %cst : f32 to vector<1x64xf32>
    %cst_2 = arith.constant 0.000000e+00 : f32
    %3 = vector.broadcast %cst_2 : f32 to vector<1x128xf32>
    %c0_3 = arith.constant 0 : index
    %c0_4 = arith.constant 0 : index
    %4 = vector.load %arg9[%c0_3, %c0_4] : memref<18x64xf32, #tpu.memory_space<vmem>>, vector<1x64xf32>
    tpu.vector_store %arg9[%c0_3, %c0_4], %2 {strides = array<i32>} : memref<18x64xf32, #tpu.memory_space<vmem>>, vector<1x64xf32>,
    %c17 = arith.constant 17 : index
    %c0_5 = arith.constant 0 : index
    %5 = vector.load %arg9[%c17, %c0_5] : memref<18x64xf32, #tpu.memory_space<vmem>>, vector<1x64xf32>
    tpu.vector_store %arg9[%c17, %c0_5], %2 {strides = array<i32>} : memref<18x64xf32, #tpu.memory_space<vmem>>, vector<1x64xf32>,
    %6 = arith.extf %1 : vector<16x64xbf16> to vector<16x64xf32>
    %c1 = arith.constant 1 : index
    %c0_6 = arith.constant 0 : index
    %7 = vector.load %arg9[%c1, %c0_6] : memref<18x64xf32, #tpu.memory_space<vmem>>, vector<16x64xf32>
    tpu.vector_store %arg9[%c1, %c0_6], %6 {strides = array<i32>} : memref<18x64xf32, #tpu.memory_space<vmem>>, vector<16x64xf32>,
    %c0_7 = arith.constant 0 : index
    %c0_8 = arith.constant 0 : index
    %8 = vector.load %arg9[%c0_7, %c0_8] : memref<18x64xf32, #tpu.memory_space<vmem>>, vector<16x64xf32>
    %9 = arith.truncf %8 : vector<16x64xf32> to vector<16x64xbf16>
    %c2 = arith.constant 2 : index
    %c0_9 = arith.constant 0 : index
    %10 = vector.load %arg9[%c2, %c0_9] : memref<18x64xf32, #tpu.memory_space<vmem>>, vector<16x64xf32>
    %11 = arith.truncf %10 : vector<16x64xf32> to vector<16x64xbf16>
    %c0_10 = arith.constant 0 : index
    %c0_11 = arith.constant 0 : index
    %c0_12 = arith.constant 0 : index
    %12 = vector.load %arg2[%c0_10, %c0_11, %c0_12] : memref<3x64x128xbf16, #tpu.memory_space<vmem>>, vector<1x64x128xbf16>
    %13 = vector.shape_cast %12 : vector<1x64x128xbf16> to vector<64x128xbf16>
    %cst_13 = arith.constant dense<0.000000e+00> : vector<16x128xf32>
    %14 = tpu.matmul %9, %13, %cst_13 {dimension_numbers = #tpu.dot_dimension_numbers<[1], [0], [0], [1], [0, 0, 1, 1], [], []>} : vector<16x64xbf16>, vector<64x128xbf16>, vector<16x128xf32> -> vector<16x128xf32>
    %c1_14 = arith.constant 1 : index
    %c0_15 = arith.constant 0 : index
    %c0_16 = arith.constant 0 : index
    %15 = vector.load %arg2[%c1_14, %c0_15, %c0_16] : memref<3x64x128xbf16, #tpu.memory_space<vmem>>, vector<1x64x128xbf16>
    %16 = vector.shape_cast %15 : vector<1x64x128xbf16> to vector<64x128xbf16>
    %cst_17 = arith.constant dense<0.000000e+00> : vector<16x128xf32>
    %17 = tpu.matmul %1, %16, %cst_17 {dimension_numbers = #tpu.dot_dimension_numbers<[1], [0], [0], [1], [0, 0, 1, 1], [], []>} : vector<16x64xbf16>, vector<64x128xbf16>, vector<16x128xf32> -> vector<16x128xf32>
    %18 = arith.addf %14, %17 : vector<16x128xf32>
    %c2_18 = arith.constant 2 : index
    %c0_19 = arith.constant 0 : index
    %c0_20 = arith.constant 0 : index
    %19 = vector.load %arg2[%c2_18, %c0_19, %c0_20] : memref<3x64x128xbf16, #tpu.memory_space<vmem>>, vector<1x64x128xbf16>
    %20 = vector.shape_cast %19 : vector<1x64x128xbf16> to vector<64x128xbf16>
    %cst_21 = arith.constant dense<0.000000e+00> : vector<16x128xf32>
    %21 = tpu.matmul %11, %20, %cst_21 {dimension_numbers = #tpu.dot_dimension_numbers<[1], [0], [0], [1], [0, 0, 1, 1], [], []>} : vector<16x64xbf16>, vector<64x128xbf16>, vector<16x128xf32> -> vector<16x128xf32>
    %22 = arith.addf %18, %21 : vector<16x128xf32>
    %c0_22 = arith.constant 0 : index
    %c0_23 = arith.constant 0 : index
    %23 = vector.load %arg3[%c0_22, %c0_23] : memref<1x128xf32, #tpu.memory_space<vmem>>, vector<1x128xf32>
    %24 = vector.broadcast %23 : vector<1x128xf32> to vector<16x128xf32>
    %25 = arith.addf %22, %24 : vector<16x128xf32>
    %cst_24 = arith.constant 0.000000e+00 : f32
    %26 = vector.broadcast %cst_24 : f32 to vector<16x128xf32>
    %27 = arith.maximumf %25, %26 : vector<16x128xf32>
    %c0_25 = arith.constant 0 : index
    %c0_26 = arith.constant 0 : index
    %28 = vector.load %arg10[%c0_25, %c0_26] : memref<18x128xf32, #tpu.memory_space<vmem>>, vector<1x128xf32>
    tpu.vector_store %arg10[%c0_25, %c0_26], %3 {strides = array<i32>} : memref<18x128xf32, #tpu.memory_space<vmem>>, vector<1x128xf32>,
    %c17_27 = arith.constant 17 : index
    %c0_28 = arith.constant 0 : index
    %29 = vector.load %arg10[%c17_27, %c0_28] : memref<18x128xf32, #tpu.memory_space<vmem>>, vector<1x128xf32>
    tpu.vector_store %arg10[%c17_27, %c0_28], %3 {strides = array<i32>} : memref<18x128xf32, #tpu.memory_space<vmem>>, vector<1x128xf32>,
    %c1_29 = arith.constant 1 : index
    %c0_30 = arith.constant 0 : index
    %30 = vector.load %arg10[%c1_29, %c0_30] : memref<18x128xf32, #tpu.memory_space<vmem>>, vector<16x128xf32>
    tpu.vector_store %arg10[%c1_29, %c0_30], %27 {strides = array<i32>} : memref<18x128xf32, #tpu.memory_space<vmem>>, vector<16x128xf32>,
    %c0_31 = arith.constant 0 : index
    %c0_32 = arith.constant 0 : index
    %31 = vector.load %arg10[%c0_31, %c0_32] : memref<18x128xf32, #tpu.memory_space<vmem>>, vector<16x128xf32>
    %32 = arith.truncf %31 : vector<16x128xf32> to vector<16x128xbf16>
    %c2_33 = arith.constant 2 : index
    %c0_34 = arith.constant 0 : index
    %33 = vector.load %arg10[%c2_33, %c0_34] : memref<18x128xf32, #tpu.memory_space<vmem>>, vector<16x128xf32>
    %34 = arith.truncf %33 : vector<16x128xf32> to vector<16x128xbf16>
    %c0_35 = arith.constant 0 : index
    %c0_36 = arith.constant 0 : index
    %c0_37 = arith.constant 0 : index
    %35 = vector.load %arg4[%c0_35, %c0_36, %c0_37] : memref<3x128x128xbf16, #tpu.memory_space<vmem>>, vector<1x128x128xbf16>
    %36 = vector.shape_cast %35 : vector<1x128x128xbf16> to vector<128x128xbf16>
    %cst_38 = arith.constant dense<0.000000e+00> : vector<16x128xf32>
    %37 = tpu.matmul %32, %36, %cst_38 {dimension_numbers = #tpu.dot_dimension_numbers<[1], [0], [0], [1], [0, 0, 1, 1], [], []>} : vector<16x128xbf16>, vector<128x128xbf16>, vector<16x128xf32> -> vector<16x128xf32>
    %38 = arith.truncf %27 : vector<16x128xf32> to vector<16x128xbf16>
    %c1_39 = arith.constant 1 : index
    %c0_40 = arith.constant 0 : index
    %c0_41 = arith.constant 0 : index
    %39 = vector.load %arg4[%c1_39, %c0_40, %c0_41] : memref<3x128x128xbf16, #tpu.memory_space<vmem>>, vector<1x128x128xbf16>
    %40 = vector.shape_cast %39 : vector<1x128x128xbf16> to vector<128x128xbf16>
    %cst_42 = arith.constant dense<0.000000e+00> : vector<16x128xf32>
    %41 = tpu.matmul %38, %40, %cst_42 {dimension_numbers = #tpu.dot_dimension_numbers<[1], [0], [0], [1], [0, 0, 1, 1], [], []>} : vector<16x128xbf16>, vector<128x128xbf16>, vector<16x128xf32> -> vector<16x128xf32>
    %42 = arith.addf %37, %41 : vector<16x128xf32>
    %c2_43 = arith.constant 2 : index
    %c0_44 = arith.constant 0 : index
    %c0_45 = arith.constant 0 : index
    %43 = vector.load %arg4[%c2_43, %c0_44, %c0_45] : memref<3x128x128xbf16, #tpu.memory_space<vmem>>, vector<1x128x128xbf16>
    %44 = vector.shape_cast %43 : vector<1x128x128xbf16> to vector<128x128xbf16>
    %cst_46 = arith.constant dense<0.000000e+00> : vector<16x128xf32>
    %45 = tpu.matmul %34, %44, %cst_46 {dimension_numbers = #tpu.dot_dimension_numbers<[1], [0], [0], [1], [0, 0, 1, 1], [], []>} : vector<16x128xbf16>, vector<128x128xbf16>, vector<16x128xf32> -> vector<16x128xf32>
    %46 = arith.addf %42, %45 : vector<16x128xf32>
    %c0_47 = arith.constant 0 : index
    %c0_48 = arith.constant 0 : index
    %47 = vector.load %arg5[%c0_47, %c0_48] : memref<1x128xf32, #tpu.memory_space<vmem>>, vector<1x128xf32>
    %48 = vector.broadcast %47 : vector<1x128xf32> to vector<16x128xf32>
    %49 = arith.addf %46, %48 : vector<16x128xf32>
    %c0_49 = arith.constant 0 : index
    %c0_50 = arith.constant 0 : index
    %50 = vector.load %arg6[%c0_49, %c0_50] : memref<64x128xbf16, #tpu.memory_space<vmem>>, vector<64x128xbf16>
    %cst_51 = arith.constant dense<0.000000e+00> : vector<16x128xf32>
    %51 = tpu.matmul %1, %50, %cst_51 {dimension_numbers = #tpu.dot_dimension_numbers<[1], [0], [0], [1], [0, 0, 1, 1], [], []>} : vector<16x64xbf16>, vector<64x128xbf16>, vector<16x128xf32> -> vector<16x128xf32>
    %c0_52 = arith.constant 0 : index
    %c0_53 = arith.constant 0 : index
    %52 = vector.load %arg7[%c0_52, %c0_53] : memref<1x128xf32, #tpu.memory_space<vmem>>, vector<1x128xf32>
    %53 = vector.broadcast %52 : vector<1x128xf32> to vector<16x128xf32>
    %54 = arith.addf %51, %53 : vector<16x128xf32>
    %55 = arith.addf %49, %54 : vector<16x128xf32>
    %cst_54 = arith.constant 0.000000e+00 : f32
    %56 = vector.broadcast %cst_54 : f32 to vector<16x128xf32>
    %57 = arith.maximumf %55, %56 : vector<16x128xf32>
    %c0_55 = arith.constant 0 : index
    %c0_56 = arith.constant 0 : index
    %c0_57 = arith.constant 0 : index
    %58 = vector.load %arg8[%c0_55, %c0_56, %c0_57] : memref<1x16x128xf32, #tpu.memory_space<vmem>>, vector<1x16x128xf32>
    %59 = vector.shape_cast %58 : vector<1x16x128xf32> to vector<16x128xf32>
    %60 = vector.shape_cast %57 : vector<16x128xf32> to vector<1x16x128xf32>
    tpu.vector_store %arg8[%c0_55, %c0_56, %c0_57], %60 {strides = array<i32>} : memref<1x16x128xf32, #tpu.memory_space<vmem>>, vector<1x16x128xf32>,
    return
  }
  func.func @transform_0(%arg0: i32) -> (i32, i32, i32) {
    %c0_i32 = arith.constant 0 : i32
    %c0_i32_0 = arith.constant 0 : i32
    %c0_i32_1 = arith.constant 0 : i32
    return %arg0, %c0_i32, %c0_i32_0 : i32, i32, i32
  }
  func.func @transform_1(%arg0: i32) -> (i32, i32, i32) {
    %c0_i32 = arith.constant 0 : i32
    %c0_i32_0 = arith.constant 0 : i32
    %c0_i32_1 = arith.constant 0 : i32
    %c0_i32_2 = arith.constant 0 : i32
    return %c0_i32, %c0_i32_0, %c0_i32_1 : i32, i32, i32
  }
  func.func @transform_2(%arg0: i32) -> (i32, i32) {
    %c0_i32 = arith.constant 0 : i32
    %c0_i32_0 = arith.constant 0 : i32
    %c0_i32_1 = arith.constant 0 : i32
    return %c0_i32, %c0_i32_0 : i32, i32
  }
  func.func @transform_3(%arg0: i32) -> (i32, i32, i32) {
    %c0_i32 = arith.constant 0 : i32
    %c0_i32_0 = arith.constant 0 : i32
    %c0_i32_1 = arith.constant 0 : i32
    %c0_i32_2 = arith.constant 0 : i32
    return %c0_i32, %c0_i32_0, %c0_i32_1 : i32, i32, i32
  }
  func.func @transform_4(%arg0: i32) -> (i32, i32) {
    %c0_i32 = arith.constant 0 : i32
    %c0_i32_0 = arith.constant 0 : i32
    %c0_i32_1 = arith.constant 0 : i32
    return %c0_i32, %c0_i32_0 : i32, i32
  }
  func.func @transform_5(%arg0: i32) -> (i32, i32) {
    %c0_i32 = arith.constant 0 : i32
    %c0_i32_0 = arith.constant 0 : i32
    %c0_i32_1 = arith.constant 0 : i32
    return %c0_i32, %c0_i32_0 : i32, i32
  }
  func.func @transform_6(%arg0: i32) -> (i32, i32) {
    %c0_i32 = arith.constant 0 : i32
    %c0_i32_0 = arith.constant 0 : i32
    %c0_i32_1 = arith.constant 0 : i32
    return %c0_i32, %c0_i32_0 : i32, i32
  }
  func.func @transform_7(%arg0: i32) -> (i32, i32, i32) {
    %c0_i32 = arith.constant 0 : i32
    %c0_i32_0 = arith.constant 0 : i32
    %c0_i32_1 = arith.constant 0 : i32
    return %arg0, %c0_i32, %c0_i32_0 : i32, i32, i32
  }
}

</mosaic_0001>

<bundles_post_ra>
// kernel: tpu_custom_call.1
= control target key start
LH: loop header
LB: loop body
LE: loop exit
PB: predicated region body
PF: predicated region fallthrough
CT: control target
= control target key end

     0   :  { %s2022_s0 = inlined_call_operand.hbm [shape: bf16[2,16,64], index: 0, kind: input, shape index: {}]   ;;  %s2023_s1 = inlined_call_operand.hbm [shape: bf16[3,64,128], index: 1, kind: input, shape index: {}]   ;;  %s2024_s2 = inlined_call_operand.vmem [shape: f32[1,128], index: 2, kind: input, shape index: {}]   ;;  %s2025_s3 = inlined_call_operand.hbm [shape: bf16[3,128,128], index: 3, kind: input, shape index: {}]   ;;  %s2026_s4 = inlined_call_operand.vmem [shape: f32[1,128], index: 4, kind: input, shape index: {}]   ;;  %s2027_s5 = inlined_call_operand.hbm [shape: bf16[64,128], index: 5, kind: input, shape index: {}]   ;;  %s2028_s6 = inlined_call_operand.vmem [shape: f32[1,128], index: 6, kind: input, shape index: {}]   ;;  %s2029_s7 = inlined_call_operand.hbm [shape: f32[2,16,128], index: 7, kind: output, shape index: {}]  }
   0x1   :  { %2036 = sst [smem:[#allocation17_spill]] %s2023_s1 }
   0x2   :  { %12 = vsyncpa [#allocation5], 0 }
   0x3   :  { %14 = vsyncpa [#allocation5 + $0x1], 0 }
   0x4   :  { %15 = vsyncpa [#allocation8], 0 }
   0x5   :  { %16 = vsyncpa [#allocation11], 0 }
   0x6   :  { %17 = vsyncpa [#allocation6], 0 }
   0x7   :  { %19 = vsyncpa [#allocation6 + $0x1], 0  ;;  %s1727_s24 = smov 0   ;;  %s1729_s25 = smov 0  }
   0x8   :  { %s1731_s26 = smov 0   ;;  %s1733_s27 = smov 0  }
   0x9 LB: > { %s1748_s28 = sadd.s32 4294967295, %s1674_s27   ;;  %s1147_s29 = sadd.s32 4294967294, %s1674_s27   ;;  %s1674_s27 = sphi %s1733_s27, %s2058_s27   ;;  %s1670_s26 = sphi %s1731_s26, %s2057_s26   ;;  %s1666_s25 = sphi %s1729_s25, %s2056_s25   ;;  %s1662_s24 = sphi %s1727_s24, %s2055_s24  }
   0xa   : > { %p45_p0 = scmp.ne.s32.totalorder %s1666_s25, %s1662_s24  ;;  %p2030_p1 = scmp.eq.s32.totalorder %s1748_s28, 0 }
   0xb   : > { %p195_p2 = scmp.eq.s32.totalorder %s1748_s28, 1  ;;  %p201_p3 = scmp.eq.s32.totalorder %s1147_s29, 1 }
   0xc   : > { %p1757_p4 = por %p2030_p1, %p45_p0  ;;  %p1148_p5 = scmp.ge.s32.totalorder %s1674_s27, 1 }
   0xd   : > { %p1762_p6 = por %p201_p3, %p45_p0  ;;  %p208_p7 = scmp.lt.s32.totalorder %s1674_s27, 3 }
   0xe   : > { %s2037_s30 = scalar_select %p1757_p4, 1, 0 }
   0xf   : > { %s2038_s8 = scalar_select %p1762_p6, 1, 0 }
  0x10   : > { %p1767_p8 = pnand %p1148_p5, %p208_p7  ;;  %s1676_s10 = smov [#allocation7]  }
  0x11   : > { %s220_s11 = sshll.u32 %s1676_s10, 4  ;;  %s1677_s13 = smov [#allocation9]   ;;  %s221_s11 = int_to_ptr.vmem [resolvable:$true] %s220_s11 }
  0x12   : > { %s2039_s9 = scalar_select %p1767_p8, 1, 0 }
  0x13   : > { %p1388_p9 = pneg %p1767_p8  ;;  %s236_s14 = sshll.u32 %s1677_s13, 4  ;;  %s237_s14 = int_to_ptr.vmem [resolvable:$true] %s236_s14 }
  0x14   : > { %s1678_s15 = smov [#allocation10]   ;;  %s1507_s17 = scalar_lea.vmem %s221_s11, 1536 }
  0x15   : > { %p1776_p11 = pnand %p1388_p9, %p2030_p1  ;;  %s252_s16 = sshll.u32 %s1678_s15, 4  ;;  %s253_s16 = int_to_ptr.vmem [resolvable:$true] %s252_s16 }
  0x16   : > { %p1508_p13 = scmp.ne.s32.totalorder %s221_s11, %s1507_s17  ;;  %p1515_p5 = scmp.lt.s32.totalorder %s221_s11, %s221_s11 }
  0x17   : > { %p1498_p12 = pneg %p1776_p11  ;;  %p1516_p7 = scmp.lt.s32.totalorder %s1507_s17, %s1507_s17 }
  0x19   : > { %p1510_p0 = pnand %p1508_p13, %p1498_p12  ;;  %p1517_p9 = por %p1516_p7, %p1515_p5 }
  0x1b   : > { %p1511_p3 = pneg %p1510_p0 }
  0x1d   : > { %p1518_p10 = pnand %p1517_p9, %p1511_p3 }
  0x1f   : > { %1521 = shalt.err (!%p1518_p10)
}
  0x20   : > { %s2031_s18 = smov 64   ;;  %s2032_s19 = smov 4  }
  0x21   : > { %s2041_s1 = sld [smem:[#allocation17_spill]]  ;;  %s1533_s22 = scalar_lea.vmem %s237_s14, 3072 }
  0x22   : > { %p1534_p13 = scmp.ne.s32.totalorder %s237_s14, %s1533_s22  ;;  %p1541_p3 = scmp.lt.s32.totalorder %s237_s14, %s237_s14 }
  0x23   : > { %p1542_p10 = scmp.lt.s32.totalorder %s1533_s22, %s1533_s22 }
  0x24   : > { %p1536_p0 = pnand %p1534_p13, %p1498_p12 }
  0x25   : > { %p1543_p7 = por %p1542_p10, %p1541_p3 }
  0x26   : > { %p1537_p5 = pneg %p1536_p0 }
  0x27   : > { %1391 = dma.hbm_to_vmem [thread:$0]  (!%p1776_p11), %s2041_s1, 1536, %s221_s11, [#allocation8], %s2031_s18, %s2031_s18, %s2032_s19  }
  0x28   : > { %p1544_p9 = pnand %p1543_p7, %p1537_p5 }
  0x2a   : > { %1547 = shalt.err (!%p1544_p9)
}
  0x2b   : > { %1394 = dma.hbm_to_vmem [thread:$0]  (!%p1776_p11), %s2025_s3, 3072, %s237_s14, [#allocation8], %s2031_s18, %s2031_s18, %s2032_s19  }
  0x2c   : > { %s1559_s10 = scalar_lea.vmem %s253_s16, 512  ;;  %p1567_p3 = scmp.lt.s32.totalorder %s253_s16, %s253_s16 }
  0x2d   : > { %p1560_p1 = scmp.ne.s32.totalorder %s253_s16, %s1559_s10  ;;  %p1568_p5 = scmp.lt.s32.totalorder %s1559_s10, %s1559_s10 }
  0x2f   : > { %p1562_p13 = pnand %p1560_p1, %p1498_p12  ;;  %p1569_p10 = por %p1568_p5, %p1567_p3 }
  0x31   : > { %p1563_p0 = pneg %p1562_p13 }
  0x33   : > { %p1570_p7 = pnand %p1569_p10, %p1563_p0 }
  0x35   : > { %1573 = shalt.err (!%p1570_p7)
}
  0x36   : > { %1397 = dma.hbm_to_vmem [thread:$0]  (!%p1776_p11), %s2027_s5, 512, %s253_s16, [#allocation11], %s2031_s18, %s2031_s18, %s2032_s19  }
  0x37   : > { %s1816_s14 = sadd.s32 1, %s1674_s27   ;;  %s32_s15 = sadd.s32 1, %s1670_s26 }
  0x38   : > { %s29_s12 = ssub.s32 %s1674_s27, %s1816_s14  ;;  %p39_p12 = scmp.ne.s32.totalorder %s1670_s26, %s1666_s25 }
  0x39   : > { %p30_p1 = scmp.eq.s32.totalorder %s29_s12, 0  ;;  %p40_p9 = scmp.eq.s32.totalorder %s1674_s27, 0 }
  0x3a   : > { %p1409_p13 = scmp.lt.s32.totalorder %s1674_s27, 2  ;;  %p1830_p3 = por %p195_p2, %p39_p12 }
  0x3b   : > { %s1826_s17 = scalar_select %p30_p1, %s1670_s26, %s32_s15  }
  0x3c   : > { %p41_p0 = por %p40_p9, %p39_p12  ;;  %s269_s21 = sand.u32 1, %s1670_s26  }
  0x3d   : > { %s2042_s20 = scalar_select %p1830_p3, 1, 0 }
  0x3e   : > { %s1215_s22 = sshll.u32 %s1674_s27, 7  ;;  %s1153_s16 = sshll.u32 %s269_s21, 3 }
  0x3f   : > { %s1839_s10 = scalar_lea.hbm %s2022_s0, %s1215_s22  ;;  %s273_s11 = scalar_lea.vmem [#allocation4], %s1153_s16 }
  0x40   : > { %s280_s13 = sshll.u32 %s273_s11, 4  ;;  %p1841_p11 = pnand %p1409_p13, %p41_p0  ;;  %s1845_s13 = int_to_ptr.vmem [resolvable:$true] %s280_s13 }
  0x41   : > { %s1847_s15 = scalar_lea.sflag [#allocation5], %s269_s21  ;;  %s1574_s18 = scalar_lea.hbm %s1839_s10, 128 }
  0x42   : > { %p1575_p2 = scmp.ne.s32.totalorder %s1839_s10, %s1574_s18  ;;  %p1576_p5 = pneg %p1841_p11 }
  0x43   : > { %s1579_s16 = scalar_lea.hbm %s2022_s0, 256  ;;  %p1580_p1 = scmp.lt.s32.totalorder %s1839_s10, %s2022_s0 }
  0x44   : > { %p1577_p10 = pnand %p1576_p5, %p1575_p2  ;;  %p1581_p12 = scmp.lt.s32.totalorder %s1579_s16, %s1574_s18 }
  0x46   : > { %p1578_p7 = pneg %p1577_p10  ;;  %p1582_p9 = por %p1581_p12, %p1580_p1 }
  0x48   : > { %p1583_p13 = pnand %p1582_p9, %p1578_p7 }
  0x4a   : > { %1586 = shalt.err (!%p1583_p13)
}
  0x4b   : > { %s1587_s21 = scalar_lea.vmem %s1845_s13, 128  ;;  %s1681_s19 = smov [#allocation4]  }
  0x4c   : > { %p1588_p0 = scmp.ne.s32.totalorder %s1845_s13, %s1587_s21  ;;  %s1592_s1 = sshll.u32 %s1681_s19, 4  ;;  %s1593_s1 = int_to_ptr.vmem [resolvable:$false] %s1592_s1 }
  0x4d   : > { %s1594_s22 = scalar_lea.vmem %s1593_s1, 256  ;;  %p1595_p10 = scmp.lt.s32.totalorder %s1845_s13, %s1593_s1 }
  0x4e   : > { %p1590_p6 = pnand %p1588_p0, %p1576_p5  ;;  %p1596_p3 = scmp.lt.s32.totalorder %s1594_s22, %s1587_s21 }
  0x50   : > { %p1591_p2 = pneg %p1590_p6  ;;  %p1597_p4 = por %p1596_p3, %p1595_p10 }
  0x52   : > { %p1598_p8 = pnand %p1597_p4, %p1591_p2 }
  0x54   : > { %1601 = shalt.err (!%p1598_p8)
}
  0x55   : > { %s2044_s18 = smov 4   ;;  %s2045_s23 = smov 64  }
  0x56   : > { %1401 = dma.hbm_to_vmem [thread:$0]  (!%p1841_p11), %s1839_s10, 128, %s1845_s13, %s1847_s15, %s2045_s23, %s2045_s23, %s2044_s18  }
  0x57   : > { %p2046_p6 = scmp.ne.s32.totalorder %s2039_s9, 0 }
  0x58   : > { %s1874_s19 = sand.u32 (!%p2046_p6), 1, %s1666_s25   ;;  %p2047_p4 = scmp.ne.s32.totalorder (!%p2046_p6), %s2037_s30, 0 }
  0x59   : > { %292 = sbr.rel (%p2046_p6) target bundleno = 592 (0x250), region = 48  ;;  %s1157_s1 = sshll.u32 (!%p2046_p6), %s1874_s19, 3 }
  0x5a   : > { %s295_s16 = scalar_lea.sflag (!%p2046_p6), [#allocation5], %s1874_s19  ;;  %s1878_s29 = scalar_lea.vmem (!%p2046_p6), [#allocation4], %s1157_s1 }
  0x5e   : > { %1645 = dma.done.wait (%p2047_p4), %s295_s16, 128  }
  0x5f   : > { %1647 = vsyncadd (%p2047_p4), %s295_s16, 4294967168  ;;  %p2048_p8 = scmp.eq.s32.totalorder %s1748_s28, 0 }
  0x61   : > { %1649 = dma.done.wait (%p2048_p8), [#allocation8], 4608   ;;  %p2049_p3 = pmov %p2048_p8 }
  0x63   : > { %1651 = vsyncadd (%p2049_p3), [#allocation8], 4294962688  ;;  %p2050_p11 = pmov %p2049_p3 }
  0x64   : > { %p2051_p5 = pmov %p2049_p3 }
  0x65   : > { %1653 = dma.done.wait (%p2050_p11), [#allocation11], 512  }
  0x66   : > { %1655 = vsyncadd (%p2051_p5), [#allocation11], 4294966784  ;;  %vm344_vm0 = vcmask 516096   ;;  %v1682_v0 = vmov 0.0   ;;  %vm1683_vm1 = vmmov 0   ;;  %v1455_v1 = vld [vmem:[#allocation7 + $0x38] sm:$0xff]  }
  0x67   : > { %1264 = vmatprep.subr.bf16.mxu0 %v1682_v0  ;;  %606 = vst [vmem:[#allocation3] sm:$0x1] %v1682_v0  ;;  %607 = vst [vmem:[#allocation3 + $0x11] sm:$0x1] %v1682_v0  ;;  %1276 = vmatprep.subr.bf16.mxu1 %v1682_v0  ;;  %v1456_v2 = vld [vmem:[#allocation7 + $0x18] sm:$0xff]   ;;  %v1457_v3 = vld [vmem:[#allocation7 + $0x30] sm:$0xff]  }
  0x68   : > { %345 = vst.msk [vmem:[#allocation2] sm:$0x1] %vm344_vm0, %v1682_v0  ;;  %346 = vst.msk [vmem:[#allocation2 + $0x11] sm:$0x1] %vm344_vm0, %v1682_v0  ;;  %1272 = vmatprep.mubr.msk.bf16.mxu0 %vm1683_vm1, %v1682_v0  ;;  %1284 = vmatprep.mubr.msk.bf16.mxu1 %vm1683_vm1, %v1682_v0  ;;  %v1458_v4 = vld [vmem:[#allocation7 + $0x10] sm:$0xff]   ;;  %v1459_v5 = vld [vmem:[#allocation7 + $0x28] sm:$0xff]  }
  0x69   : > { %1265 = vmatpush3.bf16.msra.mxu0 %v1455_v1  ;;  %1277 = vmatpush3.bf16.msra.mxu1 %v1456_v2  ;;  %v1460_v6 = vld [vmem:[#allocation7 + $0x8] sm:$0xff]   ;;  %v1907_v7 = vld [vmem:[%s1878_s29] sm:$0xff]   ;;  %vm349_vm2 = vcmask 523264   ;;  %v1461_v10 = vld [vmem:[#allocation7 + $0x20] sm:$0xff]   ;;  %s1161_s11 = sshll.u32 %s1874_s19, 4  ;;  %s1216_s18 = sshll.u32 %s1748_s28, 8 }
  0x6a   : > { %1266 = vmatprep.subr.bf16.mxu0 %v1682_v0  ;;  %1278 = vmatprep.subr.bf16.mxu1 %v1682_v0  ;;  %v347_v8 = vunpack.c.l.bf16 %v1907_v7  ;;  %v348_v9 = vunpack.c.h.bf16 %v1907_v7  ;;  %v1462_v11 = vld [vmem:[#allocation7] sm:$0xff]   ;;  %v1463_v12 = vld [vmem:[#allocation7 + $0x58] sm:$0xff]   ;;  %v1464_v13 = vld [vmem:[#allocation7 + $0x50] sm:$0xff]   ;;  %s340_s21 = scalar_lea.vmem [#allocation12], %s1161_s11  ;;  %s1979_s16 = scalar_lea.hbm %s2029_s7, %s1216_s18 }
  0x6b   : > { %v1467_v16 = vld [vmem:[#allocation9 + $0x78] sm:$0xff]   ;;  %v1465_v18 = vld [vmem:[#allocation7 + $0x48] sm:$0xff]   ;;  %v1466_v19 = vld [vmem:[#allocation7 + $0x40] sm:$0xff]   ;;  %s1045_s22 = sshll.u32 %s340_s21, 4  ;;  %s1032_s29 = scalar_lea.sflag [#allocation6], %s1874_s19  ;;  %s1974_s22 = int_to_ptr.vmem [resolvable:$true] %s1045_s22 }
  0x6c   : > { %350 = vst.msk [vmem:[#allocation2 + $0x1] sm:$0xff] %vm349_vm2, %v347_v8  ;;  %351 = vst.msk [vmem:[#allocation2 + $0x9] sm:$0xff] %vm349_vm2, %v348_v9  ;;  %v1468_v23 = vld [vmem:[#allocation9 + $0x70] sm:$0xff]   ;;  %v1469_v24 = vld [vmem:[#allocation9 + $0x68] sm:$0xff]   ;;  %s1602_s30 = scalar_lea.vmem %s1974_s22, 256  ;;  %p2052_p1 = scmp.ne.s32.totalorder %s2042_s20, 0 }
  0x6d   : > { %1267 = vmatpush3.bf16.msra.mxu0 %v1457_v3  ;;  %1279 = vmatpush3.bf16.msra.mxu1 %v1458_v4  ;;  %v1470_v25 = vld [vmem:[#allocation9 + $0x38] sm:$0xff]   ;;  %v1471_v26 = vld [vmem:[#allocation9 + $0x60] sm:$0xff]   ;;  %v1472_v27 = vld [vmem:[#allocation9 + $0x30] sm:$0xff]   ;;  %p1603_p7 = scmp.ne.s32.totalorder %s1974_s22, %s1602_s30  ;;  %s1684_s28 = smov [#allocation12]  }
  0x6e   : > { %1268 = vmatprep.subr.bf16.mxu0 %v1682_v0  ;;  %1280 = vmatprep.subr.bf16.mxu1 %v1682_v0  ;;  %v1473_v28 = vld [vmem:[#allocation9 + $0x58] sm:$0xff]   ;;  %v1474_v29 = vld [vmem:[#allocation9 + $0x28] sm:$0xff]   ;;  %v1475_v30 = vld [vmem:[#allocation9 + $0x50] sm:$0xff]   ;;  %s1606_s9 = sshll.u32 %s1684_s28, 4  ;;  %s1607_s9 = int_to_ptr.vmem [resolvable:$false] %s1606_s9 }
  0x6f   : > { %v1476_v31 = vld [vmem:[#allocation9 + $0x20] sm:$0xff]   ;;  %v1477_v32 = vld [vmem:[#allocation9 + $0x48] sm:$0xff]   ;;  %v1478_v33 = vld [vmem:[#allocation9 + $0x18] sm:$0xff]   ;;  %p1604_p12 = pnand %p1603_p7, %p2052_p1  ;;  %s1608_s10 = scalar_lea.vmem %s1607_s9, 512 }
  0x70   : > { %v1479_v34 = vld [vmem:[#allocation9 + $0x40] sm:$0xff]   ;;  %v1480_v35 = vld [vmem:[#allocation9 + $0x10] sm:$0xff]   ;;  %v1482_v36 = vld [vmem:[#allocation9 + $0x8] sm:$0xff]   ;;  %p1609_p13 = scmp.lt.s32.totalorder %s1974_s22, %s1607_s9  ;;  %p1610_p0 = scmp.lt.s32.totalorder %s1608_s10, %s1602_s30 }
  0x71   : > { %1269 = vmatpush3.bf16.msra.mxu0 %v1459_v5  ;;  %1281 = vmatpush3.bf16.msra.mxu1 %v1460_v6  ;;  %v1484_v37 = vld [vmem:[#allocation9] sm:$0xff]   ;;  %v1481_v59 = vld [vmem:[#allocation9 + $0xb8] sm:$0xff]   ;;  %v1483_v61 = vld [vmem:[#allocation9 + $0xb0] sm:$0xff]   ;;  %p1605_p9 = pneg %p1604_p12 }
  0x72   : > { %1270 = vmatprep.subr.bf16.mxu0 %v1682_v0  ;;  %1282 = vmatprep.subr.bf16.mxu1 %v1682_v0  ;;  %v1178_v48 = vld [vmem:[%s2024_s2] ss:$0 sm:$0xff]  ;;  %v1485_v62 = vld [vmem:[#allocation9 + $0xa8] sm:$0xff]   ;;  %v1487_v2 = vld [vmem:[#allocation10 + $0x18] sm:$0xff]   ;;  %p1611_p2 = por %p1610_p0, %p1609_p13 }
  0x73   : > { %v352_v14 = vld [vmem:[#allocation2] sm:$0xff]  ;;  %v353_v15 = vld [vmem:[#allocation2 + $0x8] sm:$0xff]  ;;  %v1489_v5 = vld [vmem:[#allocation10 + $0x10] sm:$0xff]  }
  0x74   : > { %v354_v17 = vpack.c.bf16 %v353_v15, %v352_v14  ;;  %v355_v20 = vld [vmem:[#allocation2 + $0x2] sm:$0xff]  ;;  %v356_v21 = vld [vmem:[#allocation2 + $0xa] sm:$0xff]  ;;  %v1488_v6 = vld [vmem:[#allocation9 + $0x98] sm:$0xff]   ;;  %p1612_p10 = pnand %p1611_p2, %p1605_p9 }
  0x75   : > { %1271 = vmatpush3.bf16.msra.mxu0 %v1461_v10  ;;  %1283 = vmatpush3.bf16.msra.mxu1 %v1462_v11  ;;  %v357_v22 = vpack.c.bf16 %v356_v21, %v355_v20  ;;  %v1486_v4 = vld [vmem:[#allocation9 + $0xa0] sm:$0xff]   ;;  %v1491_v8 = vld [vmem:[#allocation10 + $0x8] sm:$0xff]   ;;  %v1490_v9 = vld [vmem:[#allocation9 + $0x90] sm:$0xff]  }
  0x76   : > { %1288 = vmatprep.subr.bf16.mxu0 %v1682_v0  ;;  %1300 = vmatprep.subr.bf16.mxu1 %v1682_v0  ;;  %v1493_v10 = vld [vmem:[#allocation10] sm:$0xff]   ;;  %v1492_v11 = vld [vmem:[#allocation9 + $0x88] sm:$0xff]  }
  0x78   : > { %1273 = vmatmul.mubr.msk.bf16.vlgmr.msra.gmra.mxu0 %vm349_vm2, %v1907_v7  ;;  %1285 = vmatmul.mubr.msk.bf16.vlgmr.msra.gmra.mxu1 %vm349_vm2, %v354_v17 }
  0x79   : > { %1289 = vmatpush3.bf16.msra.mxu0 %v1463_v12  ;;  %1296 = vmatprep.mubr.msk.bf16.mxu0 %vm1683_vm1, %v1682_v0  ;;  %v1494_v12 = vld [vmem:[#allocation9 + $0x80] sm:$0xff]  }
  0x7a   : > { %1290 = vmatprep.subr.bf16.mxu0 %v1682_v0  ;;  %1301 = vmatpush3.bf16.msra.mxu1 %v1467_v16 }
  0x7b   : > { %1302 = vmatprep.subr.bf16.mxu1 %v1682_v0  ;;  %1316 = vmatprep.mubr.msk.bf16.mxu1 %vm1683_vm1, %v1682_v0 }
  0x7d   : > { %1291 = vmatpush3.bf16.msra.mxu0 %v1464_v13 }
  0x7e   : > { %1292 = vmatprep.subr.bf16.mxu0 %v1682_v0  ;;  %1303 = vmatpush3.bf16.msra.mxu1 %v1468_v23 }
  0x7f   : > { %1304 = vmatprep.subr.bf16.mxu1 %v1682_v0 }
  0x81   : > { %1293 = vmatpush3.bf16.msra.mxu0 %v1465_v18 }
  0x82   : > { %1294 = vmatprep.subr.bf16.mxu0 %v1682_v0  ;;  %1305 = vmatpush3.bf16.msra.mxu1 %v1469_v24 }
  0x83   : > { %1306 = vmatprep.subr.bf16.mxu1 %v1682_v0 }
  0x85   : > { %1295 = vmatpush3.bf16.msra.mxu0 %v1466_v19 }
  0x86   : > { %1320 = vmatprep.subr.bf16.mxu0 %v1682_v0  ;;  %1307 = vmatpush3.bf16.msra.mxu1 %v1471_v26 }
  0x87   : > { %1308 = vmatprep.subr.bf16.mxu1 %v1682_v0 }
  0x88   : > { %1297 = vmatmul.mubr.msk.bf16.vlgmr.msra.gmra.mxu0 %vm349_vm2, %v357_v22 }
  0x89   : > { %1336 = vmatprep.mubr.msk.bf16.mxu0 %vm1683_vm1, %v1682_v0  ;;  %1321 = vmatpush3.bf16.msra.mxu0 %v1470_v25 }
  0x8a   : > { %1322 = vmatprep.subr.bf16.mxu0 %v1682_v0  ;;  %1309 = vmatpush3.bf16.msra.mxu1 %v1473_v28 }
  0x8b   : > { %1310 = vmatprep.subr.bf16.mxu1 %v1682_v0 }
  0x8d   : > { %1323 = vmatpush3.bf16.msra.mxu0 %v1472_v27 }
  0x8e   : > { %1324 = vmatprep.subr.bf16.mxu0 %v1682_v0  ;;  %1311 = vmatpush3.bf16.msra.mxu1 %v1475_v30 }
  0x8f   : > { %1312 = vmatprep.subr.bf16.mxu1 %v1682_v0 }
  0x91   : > { %1325 = vmatpush3.bf16.msra.mxu0 %v1474_v29  ;;  %v1203_v29 = vld [vmem:[%s2026_s4] ss:$0 sm:$0xff] }
  0x92   : > { %1326 = vmatprep.subr.bf16.mxu0 %v1682_v0  ;;  %1313 = vmatpush3.bf16.msra.mxu1 %v1477_v32 }
  0x93   : > { %1314 = vmatprep.subr.bf16.mxu1 %v1682_v0 }
  0x95   : > { %1327 = vmatpush3.bf16.msra.mxu0 %v1476_v31 }
  0x96   : > { %1328 = vmatprep.subr.bf16.mxu0 %v1682_v0  ;;  %1315 = vmatpush3.bf16.msra.mxu1 %v1479_v34 }
  0x97   : > { %1340 = vmatprep.subr.bf16.mxu1 %v1682_v0 }
  0x99   : > { %1329 = vmatpush3.bf16.msra.mxu0 %v1478_v33 }
  0x9a   : > { %1330 = vmatprep.subr.bf16.mxu0 %v1682_v0 }
  0x9d   : > { %1331 = vmatpush3.bf16.msra.mxu0 %v1480_v35 }
  0x9e   : > { %1332 = vmatprep.subr.bf16.mxu0 %v1682_v0 }
  0xa1   : > { %1333 = vmatpush3.bf16.msra.mxu0 %v1482_v36 }
  0xa2   : > { %1334 = vmatprep.subr.bf16.mxu0 %v1682_v0 }
  0xa5   : > { %1335 = vmatpush3.bf16.msra.mxu0 %v1484_v37 }
  0xa6   : > { %1360 = vmatprep.subr.bf16.mxu0 %v1682_v0 }
 0x138   : > { %v441_v38 = vpop.f32.mrf.mxu0  ;;  %v509_v40 = vpop.f32.mrf.mxu1 }
 0x139   : > { %v510_v46 = vadd.f32 %v509_v40, %v441_v38 }
 0x13a   : > { %v1274_v39 = vpop.f32.mrf.mxu0  ;;  %v1286_v42 = vpop.f32.mrf.mxu1 }
 0x13c   : > { %v444_v41 = vpop.f32.mrf.mxu0  ;;  %v512_v44 = vpop.f32.mrf.mxu1 }
 0x13d   : > { %v513_v51 = vadd.f32 %v512_v44, %v444_v41 }
 0x13e   : > { %v1275_v43 = vpop.f32.mrf.mxu0  ;;  %v1287_v45 = vpop.f32.mrf.mxu1 }
 0x148   : > { %v586_v47 = vpop.f32.mrf.mxu0 }
 0x149   : > { %v593_v49 = vadd.f32 %v586_v47, %v510_v46 }
 0x14a   : > { %v1298_v50 = vpop.f32.mrf.mxu0 }
 0x14b   : > { %v602_v52 = vadd.f32 %v1178_v48, %v593_v49 }
 0x14c   : > { %v589_v53 = vpop.f32.mrf.mxu0 }
 0x14d   : > { %v604_v54 = vmax.f32 %v602_v52, 0.0  ;;  %v594_v55 = vadd.f32 %v589_v53, %v513_v51 }
 0x14e   : > { %v1299_v56 = vpop.f32.mrf.mxu0 }
 0x14f   : > { %608 = vst [vmem:[#allocation3 + $0x1] sm:$0xff] %v604_v54  ;;  %v603_v57 = vadd.f32 %v1178_v48, %v594_v55 }
 0x151   : > { %v605_v58 = vmax.f32 %v603_v57, 0.0 }
 0x153   : > { %609 = vst [vmem:[#allocation3 + $0x9] sm:$0xff] %v605_v58  ;;  %v632_v60 = vpack.c.bf16 %v605_v58, %v604_v54 }
 0x155   : > { %1317 = vmatmul.mubr.bf16.vlgmr.msra.gmra.mxu1 %v632_v60 }
 0x156   : > { %1341 = vmatpush3.bf16.msra.mxu1 %v1481_v59  ;;  %1356 = vmatprep.mubr.msk.bf16.mxu1 %vm1683_vm1, %v1682_v0  ;;  %v610_v63 = vld [vmem:[#allocation3] sm:$0xff] }
 0x157   : > { %1342 = vmatprep.subr.bf16.mxu1 %v1682_v0 }
 0x15a   : > { %1343 = vmatpush3.bf16.msra.mxu1 %v1483_v61  ;;  %v611_v1 = vld [vmem:[#allocation3 + $0x8] sm:$0xff] }
 0x15b   : > { %1344 = vmatprep.subr.bf16.mxu1 %v1682_v0  ;;  %v612_v3 = vpack.c.bf16 %v611_v1, %v610_v63  ;;  %v613_v13 = vld [vmem:[#allocation3 + $0x2] sm:$0xff]  ;;  %v614_v14 = vld [vmem:[#allocation3 + $0xa] sm:$0xff] }
 0x15c   : > { %v615_v15 = vpack.c.bf16 %v614_v14, %v613_v13 }
 0x15d   : > { %1337 = vmatmul.mubr.bf16.vlgmr.msra.gmra.mxu0 %v612_v3 }
 0x15e   : > { %1345 = vmatpush3.bf16.msra.mxu1 %v1485_v62  ;;  %1361 = vmatpush3.bf16.msra.mxu0 %v1487_v2 }
 0x15f   : > { %1346 = vmatprep.subr.bf16.mxu1 %v1682_v0  ;;  %1362 = vmatprep.subr.bf16.mxu0 %v1682_v0 }
 0x160   : > { %1368 = vmatprep.mubr.msk.bf16.mxu0 %vm1683_vm1, %v1682_v0 }
 0x162   : > { %1347 = vmatpush3.bf16.msra.mxu1 %v1486_v4  ;;  %1363 = vmatpush3.bf16.msra.mxu0 %v1489_v5 }
 0x163   : > { %1348 = vmatprep.subr.bf16.mxu1 %v1682_v0  ;;  %1364 = vmatprep.subr.bf16.mxu0 %v1682_v0 }
 0x166   : > { %1349 = vmatpush3.bf16.msra.mxu1 %v1488_v6  ;;  %1365 = vmatpush3.bf16.msra.mxu0 %v1491_v8 }
 0x167   : > { %1350 = vmatprep.subr.bf16.mxu1 %v1682_v0  ;;  %1366 = vmatprep.subr.bf16.mxu0 %v1682_v0 }
 0x16a   : > { %1351 = vmatpush3.bf16.msra.mxu1 %v1490_v9  ;;  %1367 = vmatpush3.bf16.msra.mxu0 %v1493_v10 }
 0x16b   : > { %1352 = vmatprep.subr.bf16.mxu1 %v1682_v0 }
 0x16d   : > { %1369 = vmatmul.mubr.msk.bf16.vlgmr.msra.gmra.mxu0 %vm349_vm2, %v1907_v7 }
 0x16e   : > { %1353 = vmatpush3.bf16.msra.mxu1 %v1492_v11 }
 0x16f   : > { %1354 = vmatprep.subr.bf16.mxu1 %v1682_v0  ;;  %v1204_v0 = vld [vmem:[%s2028_s6] ss:$0 sm:$0xff] }
 0x172   : > { %1355 = vmatpush3.bf16.msra.mxu1 %v1494_v12 }
 0x175   : > { %1357 = vmatmul.mubr.bf16.vlgmr.msra.gmra.mxu1 %v615_v15 }
 0x215   : > { %v732_v16 = vpop.f32.mrf.mxu1 }
 0x217   : > { %v1318_v17 = vpop.f32.mrf.mxu1 }
 0x219   : > { %v735_v18 = vpop.f32.mrf.mxu1 }
 0x21b   : > { %v1319_v19 = vpop.f32.mrf.mxu1 }
 0x21d   : > { %v821_v20 = vpop.f32.mrf.mxu0 }
 0x21e   : > { %v822_v27 = vadd.f32 %v821_v20, %v732_v16 }
 0x21f   : > { %v1338_v21 = vpop.f32.mrf.mxu0 }
 0x221   : > { %v824_v22 = vpop.f32.mrf.mxu0 }
 0x222   : > { %v825_v33 = vadd.f32 %v824_v22, %v735_v18 }
 0x223   : > { %v1339_v23 = vpop.f32.mrf.mxu0 }
 0x22d   : > { %v1018_v24 = vpop.f32.mrf.mxu0 }
 0x22e   : > { %v1019_v30 = vadd.f32 %v1204_v0, %v1018_v24 }
 0x22f   : > { %v1370_v7 = vpop.f32.mrf.mxu0 }
 0x231   : > { %v1021_v25 = vpop.f32.mrf.mxu0 }
 0x232   : > { %v1022_v40 = vadd.f32 %v1204_v0, %v1021_v25 }
 0x233   : > { %v1371_v26 = vpop.f32.mrf.mxu0 }
 0x235   : > { %v927_v28 = vpop.f32.mrf.mxu1 }
 0x236   : > { %v934_v31 = vadd.f32 %v927_v28, %v822_v27 }
 0x237   : > { %v1358_v32 = vpop.f32.mrf.mxu1 }
 0x238   : > { %v943_v34 = vadd.f32 %v1203_v29, %v934_v31 }
 0x239   : > { %v930_v35 = vpop.f32.mrf.mxu1 }
 0x23a   : > { %v1025_v36 = vadd.f32 %v1019_v30, %v943_v34  ;;  %v935_v37 = vadd.f32 %v930_v35, %v825_v33 }
 0x23b   : > { %v1359_v38 = vpop.f32.mrf.mxu1 }
 0x23c   : > { %v1027_v39 = vmax.f32 %v1025_v36, 0.0  ;;  %v944_v41 = vadd.f32 %v1203_v29, %v935_v37 }
 0x23e   : > { %1029 = vst [vmem:[%s340_s21] sm:$0xff] %v1027_v39  ;;  %v1026_v42 = vadd.f32 %v1022_v40, %v944_v41 }
 0x240   : > { %v1028_v43 = vmax.f32 %v1026_v42, 0.0 }
 0x242   : > { %1030 = vst [vmem:[%s340_s21 + $0x8] sm:$0xff] %v1028_v43 }
 0x243   : > { %1615 = shalt.err (!%p1612_p10)
}
 0x244   : > { %s1616_s13 = scalar_lea.hbm %s1979_s16, 256  ;;  %s1620_s11 = scalar_lea.hbm %s2029_s7, 512 }
 0x245   : > { %p1617_p6 = scmp.ne.s32.totalorder %s1979_s16, %s1616_s13  ;;  %p1621_p3 = scmp.lt.s32.totalorder %s1979_s16, %s2029_s7 }
 0x246   : > { %p1622_p11 = scmp.lt.s32.totalorder %s1620_s11, %s1616_s13 }
 0x247   : > { %p1618_p4 = pnand %p1617_p6, %p2052_p1 }
 0x248   : > { %p1623_p5 = por %p1622_p11, %p1621_p3 }
 0x249   : > { %p1619_p8 = pneg %p1618_p4 }
 0x24b   : > { %p1624_p7 = pnand %p1623_p5, %p1619_p8 }
 0x24d   : > { %1627 = shalt.err (!%p1624_p7)
}
 0x24e   : > { %s1685_s23 = smov 128   ;;  %s1686_s1 = smov 8  }
 0x24f   : > { %1386 = dma.vmem_to_hbm [thread:$0]  (%p2052_p1), %s1974_s22, 256, %s1979_s16, %s1032_s29, %s1685_s23, %s1685_s23, %s1686_s1  }
 0x250 PF: > { %s1060_s30 = sand.u32 1, %s1662_s24   ;;  %p2053_p12 = scmp.ne.s32.totalorder %s2038_s8, 0 }
 0x251   : > { %p2054_p9 = scmp.ge.s32.totalorder %s1674_s27, 2  ;;  %s1061_s28 = scalar_lea.sflag [#allocation6], %s1060_s30 }
 0x253   : > { %p1403_p13 = pnand %p2054_p9, %p2053_p12 }
 0x255   : > { %p1404_p0 = pneg %p1403_p13 }
 0x257   : > { %1657 = dma.done.wait (%p1404_p0), %s1061_s28, 256  }
 0x258   : > { %1659 = vsyncadd (%p1404_p0), %s1061_s28, 4294967040  ;;  %p22_p2 = scmp.ge.s32.totalorder %s1816_s14, 4   ;;  %s2055_s24 = smov %s1666_s25 }
 0x259   : > { %s2056_s25 = smov %s1670_s26  ;;  %s2057_s26 = smov %s1826_s17 }
 0x25a   : > { %s2058_s27 = smov %s1816_s14  ;;  %24 = sbr.rel (!%p22_p2) target bundleno = 9 (0x9), region = 109 }
 0x25f   :  { %1066 = vsyncpa [#allocation5], 1 }
 0x260   :  { %1068 = vsyncpa [#allocation5 + $0x1], 1 }
 0x261   :  { %1069 = vsyncpa [#allocation8], 1 }
 0x262   :  { %1070 = vsyncpa [#allocation11], 1 }
 0x263   :  { %1071 = vsyncpa [#allocation6], 1 }
 0x264   :  { %1073 = vsyncpa [#allocation6 + $0x1], 1 }

</bundles_post_ra>
